<compile_context>
chip_gen: v5e
topology: v5e:2x2
jax: 0.10.0
libtpu: 0.0.40
codegen_flags: <defaults>
</compile_context>

<pallas_src>
import jax
import jax.numpy as jnp
from jax.experimental import pallas as pl
from jax.experimental.pallas import tpu as pltpu

NUM_CLASSES = 12
NUM_LAYERS = 5
PAD = 128                     # lane-aligned width used for every packed layer
ROW_ALIGN = 16                # bf16 sublane packing: keep row tiles multiples of 16
MAX_TILE_B = 2048             # ~1 MiB/tile of bf16 activations with double buffering
NEG_MASK = -1e30              # last-layer bias pad -> exp underflows to exactly 0
COMPUTE_DTYPE = jnp.bfloat16  # MXU operand + activation-slab dtype; accumulation is f32


def _round_up(x, m):
    return (x + m - 1) // m * m


def _pick_tile_b(batch):
    """Rows per grid step: >=2 steps once there's enough work (v7x megacore + pipeline
    overlap), tiles capped at MAX_TILE_B, padded-row waste kept small (<~10%)."""
    rows = _round_up(batch, ROW_ALIGN)
    if rows < 512:
        return rows                                   # too little work to split
    steps = max(2, pl.cdiv(rows, MAX_TILE_B))
    return _round_up(pl.cdiv(rows, steps), ROW_ALIGN)


def _hand_net_kernel(x_ref, w_ref, b_ref, out_ref):
    # x_ref:   (TILE_B, 128) bf16  input slab (lanes >= size_in are zero)
    # w_ref:   (5, 128, 128) bf16  packed zero-padded weights, [in, out] layout
    # b_ref:   (5, 1, 128)   f32   packed biases (last-layer pad lanes = -1e30)
    # out_ref: (TILE_B, 128) bf16  lane-dense softmax slab (first 12 lanes valid)
    h = x_ref[...]                                        # bf16 MXU operand
    for layer in range(NUM_LAYERS - 1):                   # fc0..fc3 + ReLU
        z = jnp.dot(h, w_ref[layer],
                    preferred_element_type=jnp.float32) + b_ref[layer]
        h = jnp.maximum(z, 0.0).astype(COMPUTE_DTYPE)     # f32 elementwise, bf16 pack

    logits = jnp.dot(h, w_ref[NUM_LAYERS - 1],
                     preferred_element_type=jnp.float32) + b_ref[NUM_LAYERS - 1]

    # softmax over the lane dim; pad lanes carry -1e30 -> exp == 0 contribution.
    m = jnp.max(logits, axis=-1, keepdims=True)
    e = jnp.exp(logits - m)
    denom = jnp.sum(e, axis=-1, keepdims=True)
    out_ref[...] = (e / denom).astype(out_ref.dtype)      # exact divide: rows sum to 1


def pack_params(params):
    """params: list of (W [fan_in, fan_out], b [fan_out]) -> (5,128,128) bf16 weight
    slab and (5,1,128) f32 bias slab. Weight pads are zero; last-layer bias pads -1e30."""
    assert len(params) == NUM_LAYERS
    ws, bs = [], []
    for i, (w, b) in enumerate(params):
        fan_in, fan_out = w.shape
        assert fan_in <= PAD and fan_out <= PAD
        w_pad = jnp.zeros((PAD, PAD), jnp.float32).at[:fan_in, :fan_out].set(w)
        pad_val = NEG_MASK if i == NUM_LAYERS - 1 else 0.0
        b_pad = jnp.full((1, PAD), pad_val, jnp.float32).at[0, :fan_out].set(
            b.reshape(-1))
        ws.append(w_pad)
        bs.append(b_pad)
    return jnp.stack(ws).astype(COMPUTE_DTYPE), jnp.stack(bs)


def hand_network_forward(x, w_packed, b_packed, num_classes=NUM_CLASSES, tile_b=None):
    """x: [B, size_in] f32. Returns [B, num_classes] softmax probabilities (f32 values,
    quantized to bf16 by the output slab)."""
    B, size_in = x.shape
    assert size_in <= PAD, "size_in > 128 would need a wider packed slab"
    if tile_b is None:
        tile_b = _pick_tile_b(B)
    b_pad_rows = _round_up(B, tile_b)

    # Single fused pad+cast: the padded activation slab is bf16 (half the HBM bytes of
    # an f32 slab).  Zero rows/lanes hit zero-padded weight rows -> no effect on output.
    x_pad = jnp.zeros((b_pad_rows, PAD), COMPUTE_DTYPE).at[:B, :size_in].set(
        x.astype(COMPUTE_DTYPE))

    grid = (b_pad_rows // tile_b,)
    out = pl.pallas_call(
        _hand_net_kernel,
        out_shape=jax.ShapeDtypeStruct((b_pad_rows, PAD), COMPUTE_DTYPE),
        grid=grid,
        in_specs=[
            pl.BlockSpec((tile_b, PAD), lambda i: (i, 0)),              # x tile
            pl.BlockSpec((NUM_LAYERS, PAD, PAD), lambda i: (0, 0, 0)),  # resident W
            pl.BlockSpec((NUM_LAYERS, 1, PAD), lambda i: (0, 0, 0)),    # resident b
        ],
        out_specs=pl.BlockSpec((tile_b, PAD), lambda i: (i, 0)),
        compiler_params=pltpu.CompilerParams(
            dimension_semantics=("parallel",)),
    )(x_pad, w_packed, b_packed)

    return out[:B, :num_classes].astype(jnp.float32)


def init_params(key, size_in, num_of_classes):
    """Deterministic synthetic init mirroring nn.Linear shapes (W stored as [in,out])."""
    dims = [(size_in, 128), (128, 128), (128, 64), (64, 32), (32, num_of_classes)]
    params = []
    for i, (fan_in, fan_out) in enumerate(dims):
        kw, kb, key = jax.random.split(jax.random.fold_in(key, i), 3)
        bound = 1.0 / jnp.sqrt(jnp.float32(fan_in))
        w_t = jax.random.uniform(kw, (fan_in, fan_out), jnp.float32, -bound, bound)
        b = jax.random.uniform(kb, (fan_out,), jnp.float32, -bound, bound)
        params.append((w_t, b))
    return params


def reference_forward(x, params):
    """Pure-JAX reference mirroring the kernel numerics (bf16 dot operands, f32 rest)."""
    h = x
    for i, (w, b) in enumerate(params):
        z = jnp.dot(h.astype(COMPUTE_DTYPE), w.astype(COMPUTE_DTYPE),
                    preferred_element_type=jnp.float32) + b
        h = jnp.maximum(z, 0.0) if i < len(params) - 1 else z
    return jax.nn.softmax(h, axis=-1)


if __name__ == "__main__":
    key = jax.random.PRNGKey(0)
    size_in = 42          # e.g. 21 hand landmarks x 2 coords
    batch = 8

    kx, kp = jax.random.split(key)
    x = jax.random.normal(kx, (batch, size_in), jnp.float32)
    params = init_params(kp, size_in, NUM_CLASSES)
    w_packed, b_packed = pack_params(params)

    out = hand_network_forward(x, w_packed, b_packed)
    out = jax.block_until_ready(out)

    ref = reference_forward(x, params)
    assert out.shape == (batch, NUM_CLASSES)
    # output slab is bf16 -> allow bf16-rounding-level deviation from the f32 reference
    assert jnp.allclose(out, ref, atol=5e-3, rtol=1e-2), (
        f"max abs err {jnp.max(jnp.abs(out - ref))}")
    # exact softmax divide -> rows sum to 1 up to bf16 output rounding (<~2e-3)
    assert jnp.allclose(jnp.sum(out, axis=-1), 1.0, atol=5e-3), (
        f"row sums {jnp.sum(out, axis=-1)}")

    print("KERNEL_OK")
</pallas_src>

<mosaic_0001>
module attributes {stable_mosaic.version = 11 : i64} {
  func.func @_hand_net_kernel(%arg0: i32, %arg1: memref<16x128xbf16, #tpu.memory_space<vmem>>, %arg2: memref<5x128x128xbf16, #tpu.memory_space<vmem>>, %arg3: memref<5x1x128xf32, #tpu.memory_space<vmem>>, %arg4: memref<16x128xbf16, #tpu.memory_space<vmem>>) attributes {dimension_semantics = [#tpu.dimension_semantics<parallel>], iteration_bounds = array<i64: 1>, scalar_prefetch = 0 : i64, scratch_operands = 0 : i64, tpu.core_type = #tpu.core_type<tc>, window_params = [{transform_indices = @transform_0, window_bounds = array<i64: 16, 128>}, {pipeline_mode = #tpu.pipeline_mode<synchronous>, transform_indices = @transform_1, window_bounds = array<i64: 5, 128, 128>}, {pipeline_mode = #tpu.pipeline_mode<synchronous>, transform_indices = @transform_2, window_bounds = array<i64: 5, 1, 128>}, {transform_indices = @transform_3, window_bounds = array<i64: 16, 128>}]} {
    %c0 = arith.constant 0 : index
    %c0_0 = arith.constant 0 : index
    %0 = vector.load %arg1[%c0, %c0_0] : memref<16x128xbf16, #tpu.memory_space<vmem>>, vector<16x128xbf16>
    %c0_1 = arith.constant 0 : index
    %c0_2 = arith.constant 0 : index
    %c0_3 = arith.constant 0 : index
    %1 = vector.load %arg2[%c0_1, %c0_2, %c0_3] : memref<5x128x128xbf16, #tpu.memory_space<vmem>>, vector<1x128x128xbf16>
    %2 = vector.shape_cast %1 : vector<1x128x128xbf16> to vector<128x128xbf16>
    %cst = arith.constant dense<0.000000e+00> : vector<16x128xf32>
    %3 = tpu.matmul %0, %2, %cst {dimension_numbers = #tpu.dot_dimension_numbers<[1], [0], [0], [1], [0, 0, 1, 1], [], []>} : vector<16x128xbf16>, vector<128x128xbf16>, vector<16x128xf32> -> vector<16x128xf32>
    %c0_4 = arith.constant 0 : index
    %c0_5 = arith.constant 0 : index
    %c0_6 = arith.constant 0 : index
    %4 = vector.load %arg3[%c0_4, %c0_5, %c0_6] : memref<5x1x128xf32, #tpu.memory_space<vmem>>, vector<1x1x128xf32>
    %5 = vector.shape_cast %4 : vector<1x1x128xf32> to vector<1x128xf32>
    %6 = vector.broadcast %5 : vector<1x128xf32> to vector<16x128xf32>
    %7 = arith.addf %3, %6 : vector<16x128xf32>
    %cst_7 = arith.constant 0.000000e+00 : f32
    %8 = vector.broadcast %cst_7 : f32 to vector<16x128xf32>
    %9 = arith.maximumf %7, %8 : vector<16x128xf32>
    %10 = arith.truncf %9 : vector<16x128xf32> to vector<16x128xbf16>
    %c1 = arith.constant 1 : index
    %c0_8 = arith.constant 0 : index
    %c0_9 = arith.constant 0 : index
    %11 = vector.load %arg2[%c1, %c0_8, %c0_9] : memref<5x128x128xbf16, #tpu.memory_space<vmem>>, vector<1x128x128xbf16>
    %12 = vector.shape_cast %11 : vector<1x128x128xbf16> to vector<128x128xbf16>
    %cst_10 = arith.constant dense<0.000000e+00> : vector<16x128xf32>
    %13 = tpu.matmul %10, %12, %cst_10 {dimension_numbers = #tpu.dot_dimension_numbers<[1], [0], [0], [1], [0, 0, 1, 1], [], []>} : vector<16x128xbf16>, vector<128x128xbf16>, vector<16x128xf32> -> vector<16x128xf32>
    %c1_11 = arith.constant 1 : index
    %c0_12 = arith.constant 0 : index
    %c0_13 = arith.constant 0 : index
    %14 = vector.load %arg3[%c1_11, %c0_12, %c0_13] : memref<5x1x128xf32, #tpu.memory_space<vmem>>, vector<1x1x128xf32>
    %15 = vector.shape_cast %14 : vector<1x1x128xf32> to vector<1x128xf32>
    %16 = vector.broadcast %15 : vector<1x128xf32> to vector<16x128xf32>
    %17 = arith.addf %13, %16 : vector<16x128xf32>
    %cst_14 = arith.constant 0.000000e+00 : f32
    %18 = vector.broadcast %cst_14 : f32 to vector<16x128xf32>
    %19 = arith.maximumf %17, %18 : vector<16x128xf32>
    %20 = arith.truncf %19 : vector<16x128xf32> to vector<16x128xbf16>
    %c2 = arith.constant 2 : index
    %c0_15 = arith.constant 0 : index
    %c0_16 = arith.constant 0 : index
    %21 = vector.load %arg2[%c2, %c0_15, %c0_16] : memref<5x128x128xbf16, #tpu.memory_space<vmem>>, vector<1x128x128xbf16>
    %22 = vector.shape_cast %21 : vector<1x128x128xbf16> to vector<128x128xbf16>
    %cst_17 = arith.constant dense<0.000000e+00> : vector<16x128xf32>
    %23 = tpu.matmul %20, %22, %cst_17 {dimension_numbers = #tpu.dot_dimension_numbers<[1], [0], [0], [1], [0, 0, 1, 1], [], []>} : vector<16x128xbf16>, vector<128x128xbf16>, vector<16x128xf32> -> vector<16x128xf32>
    %c2_18 = arith.constant 2 : index
    %c0_19 = arith.constant 0 : index
    %c0_20 = arith.constant 0 : index
    %24 = vector.load %arg3[%c2_18, %c0_19, %c0_20] : memref<5x1x128xf32, #tpu.memory_space<vmem>>, vector<1x1x128xf32>
    %25 = vector.shape_cast %24 : vector<1x1x128xf32> to vector<1x128xf32>
    %26 = vector.broadcast %25 : vector<1x128xf32> to vector<16x128xf32>
    %27 = arith.addf %23, %26 : vector<16x128xf32>
    %cst_21 = arith.constant 0.000000e+00 : f32
    %28 = vector.broadcast %cst_21 : f32 to vector<16x128xf32>
    %29 = arith.maximumf %27, %28 : vector<16x128xf32>
    %30 = arith.truncf %29 : vector<16x128xf32> to vector<16x128xbf16>
    %c3 = arith.constant 3 : index
    %c0_22 = arith.constant 0 : index
    %c0_23 = arith.constant 0 : index
    %31 = vector.load %arg2[%c3, %c0_22, %c0_23] : memref<5x128x128xbf16, #tpu.memory_space<vmem>>, vector<1x128x128xbf16>
    %32 = vector.shape_cast %31 : vector<1x128x128xbf16> to vector<128x128xbf16>
    %cst_24 = arith.constant dense<0.000000e+00> : vector<16x128xf32>
    %33 = tpu.matmul %30, %32, %cst_24 {dimension_numbers = #tpu.dot_dimension_numbers<[1], [0], [0], [1], [0, 0, 1, 1], [], []>} : vector<16x128xbf16>, vector<128x128xbf16>, vector<16x128xf32> -> vector<16x128xf32>
    %c3_25 = arith.constant 3 : index
    %c0_26 = arith.constant 0 : index
    %c0_27 = arith.constant 0 : index
    %34 = vector.load %arg3[%c3_25, %c0_26, %c0_27] : memref<5x1x128xf32, #tpu.memory_space<vmem>>, vector<1x1x128xf32>
    %35 = vector.shape_cast %34 : vector<1x1x128xf32> to vector<1x128xf32>
    %36 = vector.broadcast %35 : vector<1x128xf32> to vector<16x128xf32>
    %37 = arith.addf %33, %36 : vector<16x128xf32>
    %cst_28 = arith.constant 0.000000e+00 : f32
    %38 = vector.broadcast %cst_28 : f32 to vector<16x128xf32>
    %39 = arith.maximumf %37, %38 : vector<16x128xf32>
    %40 = arith.truncf %39 : vector<16x128xf32> to vector<16x128xbf16>
    %c4 = arith.constant 4 : index
    %c0_29 = arith.constant 0 : index
    %c0_30 = arith.constant 0 : index
    %41 = vector.load %arg2[%c4, %c0_29, %c0_30] : memref<5x128x128xbf16, #tpu.memory_space<vmem>>, vector<1x128x128xbf16>
    %42 = vector.shape_cast %41 : vector<1x128x128xbf16> to vector<128x128xbf16>
    %cst_31 = arith.constant dense<0.000000e+00> : vector<16x128xf32>
    %43 = tpu.matmul %40, %42, %cst_31 {dimension_numbers = #tpu.dot_dimension_numbers<[1], [0], [0], [1], [0, 0, 1, 1], [], []>} : vector<16x128xbf16>, vector<128x128xbf16>, vector<16x128xf32> -> vector<16x128xf32>
    %c4_32 = arith.constant 4 : index
    %c0_33 = arith.constant 0 : index
    %c0_34 = arith.constant 0 : index
    %44 = vector.load %arg3[%c4_32, %c0_33, %c0_34] : memref<5x1x128xf32, #tpu.memory_space<vmem>>, vector<1x1x128xf32>
    %45 = vector.shape_cast %44 : vector<1x1x128xf32> to vector<1x128xf32>
    %46 = vector.broadcast %45 : vector<1x128xf32> to vector<16x128xf32>
    %47 = arith.addf %43, %46 : vector<16x128xf32>
    %cst_35 = arith.constant dense<0xFF800000> : vector<16xf32>
    %48 = vector.multi_reduction <maximumf>, %47, %cst_35 [1] : vector<16x128xf32> to vector<16xf32>
    %49 = vector.shape_cast %48 : vector<16xf32> to vector<16x1xf32>
    %50 = vector.broadcast %49 : vector<16x1xf32> to vector<16x128xf32>
    %51 = arith.subf %47, %50 : vector<16x128xf32>
    %52 = math.exp %51 : vector<16x128xf32>
    %cst_36 = arith.constant dense<0.000000e+00> : vector<16xf32>
    %53 = vector.multi_reduction <add>, %52, %cst_36 [1] : vector<16x128xf32> to vector<16xf32>
    %54 = vector.shape_cast %53 : vector<16xf32> to vector<16x1xf32>
    %55 = vector.broadcast %54 : vector<16x1xf32> to vector<16x128xf32>
    %56 = arith.divf %52, %55 : vector<16x128xf32>
    %57 = arith.truncf %56 : vector<16x128xf32> to vector<16x128xbf16>
    %c0_37 = arith.constant 0 : index
    %c0_38 = arith.constant 0 : index
    %58 = vector.load %arg4[%c0_37, %c0_38] : memref<16x128xbf16, #tpu.memory_space<vmem>>, vector<16x128xbf16>
    tpu.vector_store %arg4[%c0_37, %c0_38], %57 {strides = array<i32>} : memref<16x128xbf16, #tpu.memory_space<vmem>>, vector<16x128xbf16>,
    return
  }
  func.func @transform_0(%arg0: i32) -> (i32, i32) {
    %c0_i32 = arith.constant 0 : i32
    %c0_i32_0 = arith.constant 0 : i32
    return %arg0, %c0_i32 : i32, i32
  }
  func.func @transform_1(%arg0: i32) -> (i32, i32, i32) {
    %c0_i32 = arith.constant 0 : i32
    %c0_i32_0 = arith.constant 0 : i32
    %c0_i32_1 = arith.constant 0 : i32
    %c0_i32_2 = arith.constant 0 : i32
    return %c0_i32, %c0_i32_0, %c0_i32_1 : i32, i32, i32
  }
  func.func @transform_2(%arg0: i32) -> (i32, i32, i32) {
    %c0_i32 = arith.constant 0 : i32
    %c0_i32_0 = arith.constant 0 : i32
    %c0_i32_1 = arith.constant 0 : i32
    %c0_i32_2 = arith.constant 0 : i32
    return %c0_i32, %c0_i32_0, %c0_i32_1 : i32, i32, i32
  }
  func.func @transform_3(%arg0: i32) -> (i32, i32) {
    %c0_i32 = arith.constant 0 : i32
    %c0_i32_0 = arith.constant 0 : i32
    return %arg0, %c0_i32 : i32, i32
  }
}

</mosaic_0001>

<bundles_post_ra>
// kernel: tpu_custom_call.1
= control target key start
LH: loop header
LB: loop body
LE: loop exit
PB: predicated region body
PF: predicated region fallthrough
CT: control target
= control target key end

     0   :  { %8 = vsyncpa [#allocation3], 0  ;;  %s950_s0 = inlined_call_operand.hbm [shape: bf16[16,128], index: 0, kind: input, shape index: {}]   ;;  %s951_s1 = inlined_call_operand.hbm [shape: bf16[5,128,128], index: 1, kind: input, shape index: {}]   ;;  %s952_s2 = inlined_call_operand.hbm [shape: f32[5,1,128], index: 2, kind: input, shape index: {}]   ;;  %s953_s3 = inlined_call_operand.hbm [shape: bf16[16,128], index: 3, kind: output, shape index: {}]  }
   0x1   :  { %9 = vsyncpa [#allocation6], 0 }
   0x2   :  { %10 = vsyncpa [#allocation4], 0  ;;  %s28_s14 = sshll.u32 %s951_s1, 4  ;;  %s901_s15 = smov [#allocation5]   ;;  %s29_s14 = int_to_ptr.hbm [resolvable:$true] %s28_s14 }
   0x3   :  { %s30_s16 = sshll.u32 %s901_s15, 4  ;;  %s15_s19 = sshll.u32 %s950_s0, 4  ;;  %s31_s16 = int_to_ptr.vmem [resolvable:$true] %s30_s16  ;;  %s16_s19 = int_to_ptr.hbm [resolvable:$true] %s15_s19 }
   0x4   :  { %s902_s20 = smov 64   ;;  %s903_s21 = smov 4  }
   0x5   :  { %36 = dma.hbm_to_vmem [thread:$0]  %s29_s14, 5120, %s31_s16, [#allocation6], %s902_s20, %s902_s20, %s903_s21  }
   0x6   :  { %s904_s22 = smov [#allocation2]   ;;  %s41_s1 = sshll.u32 %s952_s2, 4  ;;  %s42_s1 = int_to_ptr.hbm [resolvable:$true] %s41_s1 }
   0x7   :  { %s17_s23 = sshll.u32 %s904_s22, 4  ;;  %s905_s0 = smov [#allocation7]   ;;  %s18_s23 = int_to_ptr.vmem [resolvable:$true] %s17_s23 }
   0x8   :  { %23 = dma.hbm_to_vmem [thread:$0]  %s16_s19, 128, %s18_s23, [#allocation3], %s902_s20, %s902_s20, %s903_s21  }
   0x9   :  { %s43_s26 = sshll.u32 %s905_s0, 4  ;;  %s906_s27 = smov 16   ;;  %s44_s26 = int_to_ptr.vmem [resolvable:$true] %s43_s26 }
   0xa   :  { %s907_s28 = smov 1  }
   0xb   :  { %49 = dma.hbm_to_vmem [thread:$0]  %s42_s1, 80, %s44_s26, [#allocation6], %s906_s27, %s906_s27, %s907_s28  }
   0xc   :  { %895 = dma.done.wait [#allocation3], 128  }
   0xd   :  { %896 = vsyncadd [#allocation3], 4294967168 }
   0xe   :  { %897 = dma.done.wait [#allocation6], 5200  }
   0xf   :  { %898 = vsyncadd [#allocation6], 4294962096  ;;  %v740_v0 = vld [vmem:[#allocation5 + $0x38] sm:$0xff]  ;;  %v739_v1 = vld [vmem:[#allocation5 + $0x30] sm:$0xff]  ;;  %s908_s2 = smov [#allocation8]   ;;  %s554_s5 = sshll.u32 %s953_s3, 4  ;;  %s555_s5 = int_to_ptr.hbm [resolvable:$true] %s554_s5 }
  0x10   :  { %138 = vmatpush.bf16.msra.mxu0 %v740_v0  ;;  %v748_v2 = vld [vmem:[#allocation5 + $0x78] sm:$0xff]  ;;  %v747_v3 = vld [vmem:[#allocation5 + $0x70] sm:$0xff]  ;;  %v738_v4 = vld [vmem:[#allocation5 + $0x28] sm:$0xff]  ;;  %s552_s29 = sshll.u32 %s908_s2, 4  ;;  %s553_s29 = int_to_ptr.vmem [resolvable:$true] %s552_s29 }
  0x11   :  { %225 = vmatpush.bf16.msra.mxu1 %v748_v2  ;;  %v746_v5 = vld [vmem:[#allocation5 + $0x68] sm:$0xff]  ;;  %v737_v6 = vld [vmem:[#allocation5 + $0x20] sm:$0xff]  ;;  %v736_v8 = vld [vmem:[#allocation5 + $0x18] sm:$0xff] }
  0x12   :  { %v745_v7 = vld [vmem:[#allocation5 + $0x60] sm:$0xff]  ;;  %v735_v9 = vld [vmem:[#allocation5 + $0x10] sm:$0xff]  ;;  %v734_v10 = vld [vmem:[#allocation5 + $0x8] sm:$0xff] }
  0x13   :  { %v733_v11 = vld [vmem:[#allocation5] sm:$0xff]  ;;  %v732_v12 = vld [vmem:[#allocation2] sm:$0xff]  ;;  %v743_v14 = vld [vmem:[#allocation5 + $0x50] sm:$0xff] }
  0x14   :  { %139 = vmatpush.bf16.msra.mxu0 %v739_v1  ;;  %v744_v13 = vld [vmem:[#allocation5 + $0x58] sm:$0xff]  ;;  %v742_v15 = vld [vmem:[#allocation5 + $0x48] sm:$0xff]  ;;  %v741_v16 = vld [vmem:[#allocation5 + $0x40] sm:$0xff] }
  0x15   :  { %226 = vmatpush.bf16.msra.mxu1 %v747_v3  ;;  %v756_v17 = vld [vmem:[#allocation5 + $0xb8] sm:$0xff]  ;;  %v755_v18 = vld [vmem:[#allocation5 + $0xb0] sm:$0xff]  ;;  %v754_v19 = vld [vmem:[#allocation5 + $0xa8] sm:$0xff] }
  0x16   :  { %312 = vmatpush.bf16.msra.mxu2 %v756_v17  ;;  %v753_v20 = vld [vmem:[#allocation5 + $0xa0] sm:$0xff]  ;;  %v752_v29 = vld [vmem:[#allocation5 + $0x98] sm:$0xff]  ;;  %v751_v30 = vld [vmem:[#allocation5 + $0x90] sm:$0xff] }
  0x17   :  { %v786_v22 = vld [vmem:[#allocation7] ss:$0 sm:$0xff]  ;;  %v750_v31 = vld [vmem:[#allocation5 + $0x88] sm:$0xff]  ;;  %v764_v33 = vld [vmem:[#allocation5 + $0xf8] sm:$0xff] }
  0x18   :  { %140 = vmatpush.bf16.msra.mxu0 %v738_v4  ;;  %v749_v32 = vld [vmem:[#allocation5 + $0x80] sm:$0xff]  ;;  %399 = vmatpush.bf16.msra.mxu3 %v764_v33  ;;  %v763_v34 = vld [vmem:[#allocation5 + $0xf0] sm:$0xff]  ;;  %v762_v35 = vld [vmem:[#allocation5 + $0xe8] sm:$0xff] }
  0x19   :  { %227 = vmatpush.bf16.msra.mxu1 %v746_v5  ;;  %v761_v36 = vld [vmem:[#allocation5 + $0xe0] sm:$0xff]  ;;  %v760_v45 = vld [vmem:[#allocation5 + $0xd8] sm:$0xff]  ;;  %v759_v46 = vld [vmem:[#allocation5 + $0xd0] sm:$0xff] }
  0x1a   :  { %313 = vmatpush.bf16.msra.mxu2 %v755_v18  ;;  %v787_v38 = vld [vmem:[#allocation7 + $0x1] ss:$0 sm:$0xff]  ;;  %v758_v47 = vld [vmem:[#allocation5 + $0xc8] sm:$0xff]  ;;  %v772_v49 = vld [vmem:[#allocation5 + $0x138] sm:$0xff] }
  0x1b   :  { %v757_v48 = vld [vmem:[#allocation5 + $0xc0] sm:$0xff]  ;;  %v771_v50 = vld [vmem:[#allocation5 + $0x130] sm:$0xff]  ;;  %v770_v51 = vld [vmem:[#allocation5 + $0x128] sm:$0xff] }
  0x1c   :  { %141 = vmatpush.bf16.msra.mxu0 %v737_v6  ;;  %400 = vmatpush.bf16.msra.mxu3 %v763_v34  ;;  %v769_v52 = vld [vmem:[#allocation5 + $0x120] sm:$0xff]  ;;  %v768_v61 = vld [vmem:[#allocation5 + $0x118] sm:$0xff]  ;;  %v767_v62 = vld [vmem:[#allocation5 + $0x110] sm:$0xff] }
  0x1d   :  { %228 = vmatpush.bf16.msra.mxu1 %v745_v7  ;;  %v788_v54 = vld [vmem:[#allocation7 + $0x2] ss:$0 sm:$0xff]  ;;  %v766_v63 = vld [vmem:[#allocation5 + $0x108] sm:$0xff]  ;;  %v789_v2 = vld [vmem:[#allocation7 + $0x3] ss:$0 sm:$0xff] }
  0x1e   :  { %314 = vmatpush.bf16.msra.mxu2 %v754_v19  ;;  %v765_v0 = vld [vmem:[#allocation5 + $0x100] sm:$0xff] }
  0x20   :  { %142 = vmatpush.bf16.msra.mxu0 %v736_v8  ;;  %401 = vmatpush.bf16.msra.mxu3 %v762_v35 }
  0x21   :  { %229 = vmatpush.bf16.msra.mxu1 %v744_v13 }
  0x22   :  { %315 = vmatpush.bf16.msra.mxu2 %v753_v20 }
  0x24   :  { %143 = vmatpush.bf16.msra.mxu0 %v735_v9  ;;  %402 = vmatpush.bf16.msra.mxu3 %v761_v36  ;;  %v790_v9 = vld [vmem:[#allocation7 + $0x4] ss:$0 sm:$0xff] }
  0x25   :  { %230 = vmatpush.bf16.msra.mxu1 %v743_v14 }
  0x26   :  { %316 = vmatpush.bf16.msra.mxu2 %v752_v29 }
  0x28   :  { %144 = vmatpush.bf16.msra.mxu0 %v734_v10  ;;  %403 = vmatpush.bf16.msra.mxu3 %v760_v45 }
  0x29   :  { %231 = vmatpush.bf16.msra.mxu1 %v742_v15 }
  0x2a   :  { %317 = vmatpush.bf16.msra.mxu2 %v751_v30 }
  0x2c   :  { %145 = vmatpush.bf16.msra.mxu0 %v733_v11  ;;  %404 = vmatpush.bf16.msra.mxu3 %v759_v46 }
  0x2d   :  { %232 = vmatpush.bf16.msra.mxu1 %v741_v16 }
  0x2e   :  { %318 = vmatpush.bf16.msra.mxu2 %v750_v31 }
  0x2f   :  { %146 = vmatmul.bf16.vlgmr.msra.gmra.mxu0 %v732_v12 }
  0x30   :  { %405 = vmatpush.bf16.msra.mxu3 %v758_v47  ;;  %486 = vmatpush.bf16.msrb.mxu0 %v772_v49 }
  0x32   :  { %319 = vmatpush.bf16.msra.mxu2 %v749_v32 }
  0x34   :  { %406 = vmatpush.bf16.msra.mxu3 %v757_v48  ;;  %487 = vmatpush.bf16.msrb.mxu0 %v771_v50 }
  0x38   :  { %488 = vmatpush.bf16.msrb.mxu0 %v770_v51 }
  0x3c   :  { %489 = vmatpush.bf16.msrb.mxu0 %v769_v52 }
  0x40   :  { %490 = vmatpush.bf16.msrb.mxu0 %v768_v61 }
  0x44   :  { %491 = vmatpush.bf16.msrb.mxu0 %v767_v62 }
  0x48   :  { %492 = vmatpush.bf16.msrb.mxu0 %v766_v63 }
  0x4c   :  { %493 = vmatpush.bf16.msrb.mxu0 %v765_v0 }
  0xac   :  { %v147_v21 = vpop.f32.mrf.mxu0 }
  0xad   :  { %v148_v23 = vadd.f32 %v786_v22, %v147_v21 }
  0xaf   :  { %v152_v26 = vmax.f32 %v148_v23, 0.0 }
  0xb4   :  { %v149_v24 = vpop.f32.mrf.mxu0 }
  0xb5   :  { %v150_v25 = vadd.f32 %v786_v22, %v149_v24 }
  0xb7   :  { %v153_v27 = vmax.f32 %v150_v25, 0.0 }
  0xb9   :  { %v154_v28 = vpack.c.bf16 %v153_v27, %v152_v26 }
  0xbb   :  { %233 = vmatmul.bf16.vlgmr.msra.gmra.mxu1 %v154_v28 }
 0x138   :  { %v234_v37 = vpop.f32.mrf.mxu1 }
 0x139   :  { %v235_v39 = vadd.f32 %v787_v38, %v234_v37 }
 0x13b   :  { %v239_v42 = vmax.f32 %v235_v39, 0.0 }
 0x140   :  { %v236_v40 = vpop.f32.mrf.mxu1 }
 0x141   :  { %v237_v41 = vadd.f32 %v787_v38, %v236_v40 }
 0x143   :  { %v240_v43 = vmax.f32 %v237_v41, 0.0 }
 0x145   :  { %v241_v44 = vpack.c.bf16 %v240_v43, %v239_v42 }
 0x147   :  { %320 = vmatmul.bf16.vlgmr.msra.gmra.mxu2 %v241_v44 }
 0x1ca   :  { %v321_v53 = vpop.f32.mrf.mxu2 }
 0x1cb   :  { %v322_v55 = vadd.f32 %v788_v54, %v321_v53 }
 0x1cd   :  { %v326_v58 = vmax.f32 %v322_v55, 0.0 }
 0x1d2   :  { %v323_v56 = vpop.f32.mrf.mxu2 }
 0x1d3   :  { %v324_v57 = vadd.f32 %v788_v54, %v323_v56 }
 0x1d5   :  { %v327_v59 = vmax.f32 %v324_v57, 0.0 }
 0x1d7   :  { %v328_v60 = vpack.c.bf16 %v327_v59, %v326_v58 }
 0x1d9   :  { %407 = vmatmul.bf16.vlgmr.msra.gmra.mxu3 %v328_v60 }
 0x25c   :  { %v408_v1 = vpop.f32.mrf.mxu3 }
 0x25d   :  { %v409_v3 = vadd.f32 %v789_v2, %v408_v1 }
 0x25f   :  { %v413_v6 = vmax.f32 %v409_v3, 0.0 }
 0x264   :  { %v410_v4 = vpop.f32.mrf.mxu3 }
 0x265   :  { %v411_v5 = vadd.f32 %v789_v2, %v410_v4 }
 0x267   :  { %v414_v7 = vmax.f32 %v411_v5, 0.0 }
 0x269   :  { %v415_v8 = vpack.c.bf16 %v414_v7, %v413_v6 }
 0x26b   :  { %494 = vmatmul.bf16.vlgmr.msrb.gmra.mxu0 %v415_v8 }
 0x2e8   :  { %v495_v10 = vpop.f32.mrf.mxu0 }
 0x2e9   :  { %v496_v11 = vadd.f32 %v790_v9, %v495_v10 }
 0x2eb   :  { %500 = vmax.xlane.f32.xlu0 %v496_v11 }
 0x2f0   :  { %v497_v12 = vpop.f32.mrf.mxu0 }
 0x2f1   :  { %v498_v13 = vadd.f32 %v790_v9, %v497_v12 }
 0x2f3   :  { %502 = vmax.xlane.f32.xlu0 %v498_v13 }
 0x35e   :  { %v501_v14 = vpop.xlane.xlu0 %500 }
 0x35f   :  { %v504_v15 = vsub.f32 %v496_v11, %v501_v14 }
 0x361   :  { %v506_v16 = vmul.f32 1.442695, %v504_v15 }
 0x363   :  { %791 = vpow2.f32 %v506_v16 }
 0x366   :  { %v503_v17 = vpop.xlane.xlu0 %502 }
 0x367   :  { %v505_v18 = vsub.f32 %v498_v13, %v503_v17 }
 0x369   :  { %v792_v19 = vpop.eup %791  ;;  %v508_v20 = vmul.f32 1.442695, %v505_v18 }
 0x36a   :  { %510 = vadd.xlane.f32.xlu1 %v792_v19 }
 0x36b   :  { %793 = vpow2.f32 %v508_v20 }
 0x371   :  { %v794_v21 = vpop.eup %793 }
 0x372   :  { %512 = vadd.xlane.f32.xlu1 %v794_v21 }
 0x3dd   :  { %v511_v22 = vpop.xlane.xlu1 %510 }
 0x3de   :  { %795 = vrcp.f32 %v511_v22  ;;  %v525_v31 = vand.u32 2147483648, %v511_v22  ;;  %vm519_vm1 = vweird.f32 %v511_v22  ;;  %v523_v32 = vand.u32 2147483647, %v511_v22 }
 0x3e0   :  { %v526_v38 = vor.u32 1.1754944e-38, %v525_v31  ;;  %vm524_vm4 = vcmp.eq.f32.partialorder %v523_v32, 8.507059e+37 }
 0x3e4   :  { %v796_v23 = vpop.eup %795 }
 0x3e5   :  { %v515_v24 = vmul.f32 %v796_v23, %v511_v22  ;;  %v513_v25 = vpop.xlane.xlu1 %512  ;;  %vm520_vm0 = vweird.f32 %v796_v23 }
 0x3e6   :  { %797 = vrcp.f32 %v513_v25  ;;  %vm521_vm2 = vmor %vm519_vm1, %vm520_vm0  ;;  %v540_v34 = vand.u32 2147483648, %v513_v25  ;;  %v538_v36 = vand.u32 2147483647, %v513_v25  ;;  %vm534_vm5 = vweird.f32 %v513_v25 }
 0x3e7   :  { %v516_v26 = vsub.f32 1.0, %v515_v24 }
 0x3e8   :  { %v541_v40 = vor.u32 1.1754944e-38, %v540_v34  ;;  %vm539_vm7 = vcmp.eq.f32.partialorder %v538_v36, 8.507059e+37 }
 0x3e9   :  { %v517_v27 = vmul.f32 %v796_v23, %v516_v26 }
 0x3eb   :  { %v518_v29 = vadd.f32 %v796_v23, %v517_v27 }
 0x3ec   :  { %v798_v28 = vpop.eup %797 }
 0x3ed   :  { %v530_v30 = vmul.f32 %v798_v28, %v513_v25  ;;  %vm535_vm3 = vweird.f32 %v798_v28  ;;  %v522_v37 = vsel %vm521_vm2, %v796_v23, %v518_v29 }
 0x3ee   :  { %vm536_vm6 = vmor %vm534_vm5, %vm535_vm3  ;;  %v527_v41 = vsel %vm524_vm4, %v526_v38, %v522_v37 }
 0x3ef   :  { %v531_v33 = vsub.f32 1.0, %v530_v30  ;;  %v528_v44 = vmul.f32 %v792_v19, %v527_v41 }
 0x3f1   :  { %v532_v35 = vmul.f32 %v798_v28, %v531_v33 }
 0x3f3   :  { %v533_v39 = vadd.f32 %v798_v28, %v532_v35 }
 0x3f5   :  { %v537_v42 = vsel %vm536_vm6, %v798_v28, %v533_v39 }
 0x3f6   :  { %v542_v43 = vsel %vm539_vm7, %v541_v40, %v537_v42 }
 0x3f7   :  { %v543_v45 = vmul.f32 %v794_v21, %v542_v43 }
 0x3f9   :  { %v776_v46 = vpack.c.bf16 %v543_v45, %v528_v44 }
 0x3fb   :  { %777 = vst [vmem:[#allocation8] sm:$0xff] %v776_v46  }
 0x3fc   :  { %560 = dma.vmem_to_hbm [thread:$0]  %s553_s29, 128, %s555_s5, [#allocation4], %s902_s20, %s902_s20, %s903_s21  }
 0x3fd   :  { %899 = dma.done.wait [#allocation4], 128  }
 0x3fe   :  { %900 = vsyncadd [#allocation4], 4294967168 }
 0x3ff   :  { %565 = vsyncpa [#allocation3], 1 }
 0x400   :  { %566 = vsyncpa [#allocation6], 1 }
 0x401   :  { %567 = vsyncpa [#allocation4], 1 }

</bundles_post_ra>
